<compile_context>
chip_gen: v7x
topology: tpu7x:2x2x1
jax: 0.10.0
libtpu: 0.0.40
codegen_flags: <defaults>
</compile_context>

<pallas_src>
import functools

import jax
import jax.numpy as jnp
from jax.experimental import pallas as pl
from jax.experimental.pallas import tpu as pltpu

LN_EPS = 1e-5  # PyTorch nn.LayerNorm default


# ---------------------------------------------------------------------------
# align_corners=True x2 upsample helpers
# ---------------------------------------------------------------------------
def _up2_lerp_coords(n):
    """Per-output lo index and hi-weight of a 1D x2 align_corners upsample."""
    m = 2 * n
    if n == 1:
        return jnp.zeros((m,), jnp.int32), jnp.zeros((m,), jnp.float32)
    pos = jnp.arange(m, dtype=jnp.float32) * ((n - 1) / (m - 1))
    lo = jnp.clip(jnp.floor(pos).astype(jnp.int32), 0, n - 2)
    return lo, pos - lo.astype(jnp.float32)


def _up2_matrix(n):
    """Dense (2n, n) x2 align_corners upsample operator (tiny; for L/H axes)."""
    lo, frac = _up2_lerp_coords(n)
    oh_lo = jax.nn.one_hot(lo, n, dtype=jnp.float32)
    oh_hi = jax.nn.one_hot(jnp.minimum(lo + 1, n - 1), n, dtype=jnp.float32)
    return (1.0 - frac)[:, None] * oh_lo + frac[:, None] * oh_hi


def _pre_upsample_lh(x):
    """(B, C, w, l, h) -> (B, C, w, 2l, 2h): inner-axis lerps as two einsums."""
    _, _, _, l0, h0 = x.shape
    x = jnp.einsum("bcwlh,Hh->bcwlH", x, _up2_matrix(h0))
    x = jnp.einsum("bcwlH,Ll->bcwLH", x, _up2_matrix(l0))
    return x


# ---------------------------------------------------------------------------
# Reference-only trilinear upsample (independent take-based path)
# ---------------------------------------------------------------------------
def _upsample1d_x2_align_corners(x, axis):
    n = x.shape[axis]
    m = 2 * n
    if n == 1:
        return jnp.repeat(x, 2, axis=axis)
    pos = jnp.arange(m, dtype=jnp.float32) * ((n - 1) / (m - 1))
    lo = jnp.clip(jnp.floor(pos).astype(jnp.int32), 0, n - 2)
    w_hi = pos - lo.astype(jnp.float32)
    x_lo = jnp.take(x, lo, axis=axis)
    x_hi = jnp.take(x, lo + 1, axis=axis)
    shape = [1] * x.ndim
    shape[axis] = m
    w_hi = w_hi.reshape(shape)
    return x_lo * (1.0 - w_hi) + x_hi * w_hi


def trilinear_upsample_x2(x):
    for ax in (2, 3, 4):
        x = _upsample1d_x2_align_corners(x, ax)
    return x


# ---------------------------------------------------------------------------
# Pallas kernel: fused W-lerp + LayerNorm(F) + folded Linear + recons multiply
# ---------------------------------------------------------------------------
def _fused_head_kernel(wlo_ref, xlo_ref, xhi_ref, rlo_ref, rhi_ref,
                       w_ref, b_ref, o_ref, *, w_scale):
    """One (output-W row, column tile):
         wlo_ref : (2*w0,) int32 SMEM   low-res W slab index per output row
         xlo/xhi : (F,  TCOL)           half-upsampled x slabs at wlo / wlo+1
         rlo/rhi : (Cr, TCOL)           half-upsampled recons slabs
         w_ref   : (C, F)               Linear weight with LN gamma folded in
         b_ref   : (C, 1)               Linear bias with LN beta folded in
         o_ref   : (C, TCOL)            output logits (float32, lane-dense)
    """
    i = pl.program_id(1)
    # Hi-slab lerp weight for this output W row (same formula as the wrapper).
    a = i.astype(jnp.float32) * w_scale - wlo_ref[i].astype(jnp.float32)

    x_lo = xlo_ref[...].astype(jnp.float32)
    x_hi = xhi_ref[...].astype(jnp.float32)
    xw = (1.0 - a) * x_lo + a * x_hi                   # fused W-axis lerp

    # LayerNorm over the feature (sublane) axis.
    mean = jnp.mean(xw, axis=0, keepdims=True)         # (1, TCOL)
    xc = xw - mean
    var = jnp.mean(xc * xc, axis=0, keepdims=True)
    rstd = jax.lax.rsqrt(var + LN_EPS)

    # Linear on the centered features; per-column rstd applied to the small
    # (C, TCOL) result instead of the (F, TCOL) tile.
    zc = jnp.dot(w_ref[...], xc, preferred_element_type=jnp.float32)
    logits = zc * rstd + b_ref[...]

    r_lo = rlo_ref[...].astype(jnp.float32)
    r_hi = rhi_ref[...].astype(jnp.float32)
    rw = (1.0 - a) * r_lo + a * r_hi                   # recons W-lerp
    o_ref[...] = (logits * rw).astype(o_ref.dtype)


def _choose_tcol(mc_pad, f, cr, c, x_itemsize, *,
                 vmem_budget=10 * 1024 * 1024, cap=8192):
    """Largest multiple-of-128 divisor of mc_pad under the VMEM budget / cap."""
    # double-buffered lo+hi x and recons tiles + double-buffered output tile
    per_col = 4 * f * x_itemsize + 4 * cr * x_itemsize + 2 * c * 4
    limit = min(cap, max(128, int(vmem_budget // per_col)), mc_pad)
    t = (limit // 128) * 128
    while t > 128 and mc_pad % t:
        t -= 128
    return t


# ---------------------------------------------------------------------------
# Forward (HeaderV5 semantics)
# ---------------------------------------------------------------------------
def header_v5_forward(x3d_l1, recons_logit, params, *, class_num,
                      x_dtype=jnp.float32):
    """x_dtype=jnp.bfloat16 halves the dominant HBM stream (LN stats / matmul
    stay f32); the default float32 keeps exact float32 module parity."""
    b, f, w0, l0, h0 = x3d_l1.shape
    assert b == 1, "HeaderV5 squeezes the batch dim; batch must be 1"
    cr = recons_logit.shape[1]
    wout, lout, hout = 2 * w0, 2 * l0, 2 * h0
    mc = lout * hout                                   # columns per output W row

    # Inner-axis (L, H) lerps in the wrapper; the W-axis lerp is fused below.
    x_hl = _pre_upsample_lh(x3d_l1.astype(jnp.float32)).astype(x_dtype)
    r_hl = _pre_upsample_lh(recons_logit.astype(jnp.float32)).astype(x_dtype)

    # Lane-dense 2-D views (free reshapes); pad the per-row column count to a
    # multiple of 128 only when unavoidable (typical SGN shapes need no pad).
    mc_pad = -(-mc // 128) * 128
    x3 = x_hl[0].reshape(f, w0, mc)
    r3 = r_hl[0].reshape(cr, w0, mc)
    if mc_pad != mc:
        x3 = jnp.pad(x3, ((0, 0), (0, 0), (0, mc_pad - mc)))
        r3 = jnp.pad(r3, ((0, 0), (0, 0), (0, mc_pad - mc)))
    x2d = x3.reshape(f, w0 * mc_pad)
    r2d = r3.reshape(cr, w0 * mc_pad)

    # Per-output-row low-res W slab index (scalar-prefetched into SMEM).
    wlo, _ = _up2_lerp_coords(w0)
    w_scale = (w0 - 1) / (wout - 1) if w0 > 1 else 0.0

    # Fold the LayerNorm affine into the Linear (exact algebraic identity).
    w_fold = (params["lin_weight"] * params["ln_gamma"][None, :]).astype(jnp.float32)
    b_fold = (params["lin_weight"] @ params["ln_beta"]
              + params["lin_bias"]).reshape(class_num, 1).astype(jnp.float32)

    tcol = _choose_tcol(mc_pad, f, cr, class_num, jnp.dtype(x_dtype).itemsize)
    ncol = mc_pad // tcol
    wmax = w0 - 1

    def x_lo_map(j, i, wlo_s):
        return (0, wlo_s[i] * ncol + j)

    def x_hi_map(j, i, wlo_s):
        return (0, jnp.minimum(wlo_s[i] + 1, wmax) * ncol + j)

    def out_map(j, i, wlo_s):
        return (0, i * ncol + j)

    def rep_map(j, i, wlo_s):
        return (0, 0)

    out2d = pl.pallas_call(
        functools.partial(_fused_head_kernel, w_scale=w_scale),
        out_shape=jax.ShapeDtypeStruct((class_num, wout * mc_pad), jnp.float32),
        grid_spec=pltpu.PrefetchScalarGridSpec(
            num_scalar_prefetch=1,
            grid=(ncol, wout),        # W innermost: lo/hi slab DMAs get reused
            in_specs=[
                pl.BlockSpec((f, tcol), x_lo_map),
                pl.BlockSpec((f, tcol), x_hi_map),
                pl.BlockSpec((cr, tcol), x_lo_map),
                pl.BlockSpec((cr, tcol), x_hi_map),
                pl.BlockSpec((class_num, f), rep_map),
                pl.BlockSpec((class_num, 1), rep_map),
            ],
            out_specs=pl.BlockSpec((class_num, tcol), out_map),
        ),
        compiler_params=pltpu.CompilerParams(
            # wout = 2*w0 is always even -> shards evenly over v7x's 2 TCs.
            dimension_semantics=("parallel", "parallel")),
    )(wlo, x2d, x2d, r2d, r2d, w_fold, b_fold)

    out3 = out2d.reshape(class_num, wout, mc_pad)
    if mc_pad != mc:
        out3 = out3[:, :, :mc]
    ssc_logit = out3.reshape(1, class_num, wout, lout, hout)
    return {"ssc_logit": ssc_logit}


def init_params(key, feature, class_num):
    k1, k2, k3, k4 = jax.random.split(key, 4)
    ln_gamma = jnp.ones((feature,), jnp.float32) + 0.01 * jax.random.normal(
        k1, (feature,), jnp.float32)
    ln_beta = 0.01 * jax.random.normal(k2, (feature,), jnp.float32)
    bound = 1.0 / (feature ** 0.5)
    lin_weight = jax.random.uniform(
        k3, (class_num, feature), jnp.float32, minval=-bound, maxval=bound)
    lin_bias = jax.random.uniform(
        k4, (class_num,), jnp.float32, minval=-bound, maxval=bound)
    return {"ln_gamma": ln_gamma, "ln_beta": ln_beta,
            "lin_weight": lin_weight, "lin_bias": lin_bias}


def _reference_forward(x3d_l1, recons_logit, params, *, class_num):
    """Pure-JAX reference (unfused math, torch op order, take-based upsample)."""
    x_up = trilinear_upsample_x2(x3d_l1)
    r_up = trilinear_upsample_x2(recons_logit)
    _, f, w, l, h = x_up.shape
    x_flat = jnp.transpose(x_up[0], (1, 2, 3, 0)).reshape(-1, f).astype(jnp.float32)
    mean = jnp.mean(x_flat, axis=-1, keepdims=True)
    var = jnp.mean((x_flat - mean) ** 2, axis=-1, keepdims=True)
    xn = (x_flat - mean) / jnp.sqrt(var + LN_EPS)
    xn = xn * params["ln_gamma"] + params["ln_beta"]
    logits = xn @ params["lin_weight"].T + params["lin_bias"]
    ssc = jnp.transpose(logits.reshape(w, l, h, class_num), (3, 0, 1, 2))[None]
    return (ssc * r_up).astype(jnp.float32)


if __name__ == "__main__":
    key = jax.random.PRNGKey(0)
    feature = 32
    class_num = 16
    W0, L0, H0 = 8, 8, 4      # low-res volume; upsampled (16, 16, 8) -> 2048 voxels

    kx, kr, kp = jax.random.split(key, 3)
    x3d_l1 = jax.random.normal(kx, (1, feature, W0, L0, H0), jnp.float32)
    recons_logit = jax.random.normal(kr, (1, 1, W0, L0, H0), jnp.float32)
    params = init_params(kp, feature, class_num)

    fwd = jax.jit(functools.partial(header_v5_forward, class_num=class_num))
    res = fwd(x3d_l1, recons_logit, params)
    ssc_logit = jax.block_until_ready(res["ssc_logit"])

    assert ssc_logit.shape == (1, class_num, 2 * W0, 2 * L0, 2 * H0), ssc_logit.shape
    assert ssc_logit.dtype == jnp.float32

    ref = _reference_forward(x3d_l1, recons_logit, params, class_num=class_num)
    max_err = float(jnp.max(jnp.abs(ssc_logit - ref)))
    assert jnp.allclose(ssc_logit, ref, atol=1e-3, rtol=1e-3), max_err

    print("KERNEL_OK")
</pallas_src>

<mosaic_0001>
module attributes {stable_mosaic.version = 11 : i64} {
  func.func @_fused_head_kernel(%arg0: i32, %arg1: i32, %arg2: memref<16xi32, #tpu.memory_space<smem>>, %arg3: memref<32x128xf32, #tpu.memory_space<vmem>>, %arg4: memref<32x128xf32, #tpu.memory_space<vmem>>, %arg5: memref<1x128xf32, #tpu.memory_space<vmem>>, %arg6: memref<1x128xf32, #tpu.memory_space<vmem>>, %arg7: memref<16x32xf32, #tpu.memory_space<vmem>>, %arg8: memref<16x1xf32, #tpu.memory_space<vmem>>, %arg9: memref<16x128xf32, #tpu.memory_space<vmem>>) attributes {dimension_semantics = [#tpu.dimension_semantics<parallel>, #tpu.dimension_semantics<parallel>], iteration_bounds = array<i64: 1, 16>, scalar_prefetch = 1 : i64, scratch_operands = 0 : i64, tpu.core_type = #tpu.core_type<tc>, window_params = [{transform_indices = @transform_0, window_bounds = array<i64: 32, 128>}, {transform_indices = @transform_1, window_bounds = array<i64: 32, 128>}, {transform_indices = @transform_2, window_bounds = array<i64: 1, 128>}, {transform_indices = @transform_3, window_bounds = array<i64: 1, 128>}, {pipeline_mode = #tpu.pipeline_mode<synchronous>, transform_indices = @transform_4, window_bounds = array<i64: 16, 32>}, {pipeline_mode = #tpu.pipeline_mode<synchronous>, transform_indices = @transform_5, window_bounds = array<i64: 16, 1>}, {transform_indices = @transform_6, window_bounds = array<i64: 16, 128>}]} {
    %0 = arith.sitofp %arg1 : i32 to f32
    %cst = arith.constant 0.466666669 : f32
    %1 = arith.mulf %0, %cst : f32
    %2 = arith.index_cast %arg1 : i32 to index
    %3 = memref.load %arg2[%2] : memref<16xi32, #tpu.memory_space<smem>>
    %4 = arith.sitofp %3 : i32 to f32
    %5 = arith.subf %1, %4 : f32
    %c0 = arith.constant 0 : index
    %c0_0 = arith.constant 0 : index
    %6 = vector.load %arg3[%c0, %c0_0] : memref<32x128xf32, #tpu.memory_space<vmem>>, vector<32x128xf32>
    %c0_1 = arith.constant 0 : index
    %c0_2 = arith.constant 0 : index
    %7 = vector.load %arg4[%c0_1, %c0_2] : memref<32x128xf32, #tpu.memory_space<vmem>>, vector<32x128xf32>
    %cst_3 = arith.constant 1.000000e+00 : f32
    %8 = arith.subf %cst_3, %5 : f32
    %9 = vector.broadcast %8 : f32 to vector<32x128xf32>
    %10 = arith.mulf %9, %6 : vector<32x128xf32>
    %11 = vector.broadcast %5 : f32 to vector<32x128xf32>
    %12 = arith.mulf %11, %7 : vector<32x128xf32>
    %13 = arith.addf %10, %12 : vector<32x128xf32>
    %cst_4 = arith.constant dense<0.000000e+00> : vector<128xf32>
    %14 = vector.multi_reduction <add>, %13, %cst_4 [0] : vector<32x128xf32> to vector<128xf32>
    %15 = vector.shape_cast %14 : vector<128xf32> to vector<1x128xf32>
    %cst_5 = arith.constant 3.200000e+01 : f32
    %16 = vector.broadcast %cst_5 : f32 to vector<1x128xf32>
    %17 = arith.divf %15, %16 : vector<1x128xf32>
    %18 = vector.broadcast %17 : vector<1x128xf32> to vector<32x128xf32>
    %19 = arith.subf %13, %18 : vector<32x128xf32>
    %20 = arith.mulf %19, %19 : vector<32x128xf32>
    %cst_6 = arith.constant dense<0.000000e+00> : vector<128xf32>
    %21 = vector.multi_reduction <add>, %20, %cst_6 [0] : vector<32x128xf32> to vector<128xf32>
    %22 = vector.shape_cast %21 : vector<128xf32> to vector<1x128xf32>
    %cst_7 = arith.constant 3.200000e+01 : f32
    %23 = vector.broadcast %cst_7 : f32 to vector<1x128xf32>
    %24 = arith.divf %22, %23 : vector<1x128xf32>
    %cst_8 = arith.constant 9.99999974E-6 : f32
    %25 = vector.broadcast %cst_8 : f32 to vector<1x128xf32>
    %26 = arith.addf %24, %25 : vector<1x128xf32>
    %27 = math.rsqrt %26 : vector<1x128xf32>
    %c0_9 = arith.constant 0 : index
    %c0_10 = arith.constant 0 : index
    %28 = vector.load %arg7[%c0_9, %c0_10] : memref<16x32xf32, #tpu.memory_space<vmem>>, vector<16x32xf32>
    %cst_11 = arith.constant dense<0.000000e+00> : vector<16x128xf32>
    %29 = tpu.matmul %28, %19, %cst_11 {dimension_numbers = #tpu.dot_dimension_numbers<[1], [0], [0], [1], [0, 0, 1, 1], [], []>} : vector<16x32xf32>, vector<32x128xf32>, vector<16x128xf32> -> vector<16x128xf32>
    %30 = vector.broadcast %27 : vector<1x128xf32> to vector<16x128xf32>
    %31 = arith.mulf %29, %30 : vector<16x128xf32>
    %c0_12 = arith.constant 0 : index
    %c0_13 = arith.constant 0 : index
    %32 = vector.load %arg8[%c0_12, %c0_13] : memref<16x1xf32, #tpu.memory_space<vmem>>, vector<16x1xf32>
    %33 = vector.broadcast %32 : vector<16x1xf32> to vector<16x128xf32>
    %34 = arith.addf %31, %33 : vector<16x128xf32>
    %c0_14 = arith.constant 0 : index
    %c0_15 = arith.constant 0 : index
    %35 = vector.load %arg5[%c0_14, %c0_15] : memref<1x128xf32, #tpu.memory_space<vmem>>, vector<1x128xf32>
    %c0_16 = arith.constant 0 : index
    %c0_17 = arith.constant 0 : index
    %36 = vector.load %arg6[%c0_16, %c0_17] : memref<1x128xf32, #tpu.memory_space<vmem>>, vector<1x128xf32>
    %cst_18 = arith.constant 1.000000e+00 : f32
    %37 = arith.subf %cst_18, %5 : f32
    %38 = vector.broadcast %37 : f32 to vector<1x128xf32>
    %39 = arith.mulf %38, %35 : vector<1x128xf32>
    %40 = vector.broadcast %5 : f32 to vector<1x128xf32>
    %41 = arith.mulf %40, %36 : vector<1x128xf32>
    %42 = arith.addf %39, %41 : vector<1x128xf32>
    %43 = vector.broadcast %42 : vector<1x128xf32> to vector<16x128xf32>
    %44 = arith.mulf %34, %43 : vector<16x128xf32>
    %c0_19 = arith.constant 0 : index
    %c0_20 = arith.constant 0 : index
    %45 = vector.load %arg9[%c0_19, %c0_20] : memref<16x128xf32, #tpu.memory_space<vmem>>, vector<16x128xf32>
    tpu.vector_store %arg9[%c0_19, %c0_20], %44 {strides = array<i32>} : memref<16x128xf32, #tpu.memory_space<vmem>>, vector<16x128xf32>,
    return
  }
  func.func @transform_0(%arg0: i32, %arg1: i32, %arg2: memref<16xi32, #tpu.memory_space<smem>>) -> (i32, i32) {
    %0 = arith.index_cast %arg1 : i32 to index
    %1 = memref.load %arg2[%0] : memref<16xi32, #tpu.memory_space<smem>>
    %c1_i32 = arith.constant 1 : i32
    %2 = arith.muli %1, %c1_i32 : i32
    %3 = arith.addi %2, %arg0 : i32
    %c0_i32 = arith.constant 0 : i32
    %c0_i32_0 = arith.constant 0 : i32
    return %c0_i32, %3 : i32, i32
  }
  func.func @transform_1(%arg0: i32, %arg1: i32, %arg2: memref<16xi32, #tpu.memory_space<smem>>) -> (i32, i32) {
    %0 = arith.index_cast %arg1 : i32 to index
    %1 = memref.load %arg2[%0] : memref<16xi32, #tpu.memory_space<smem>>
    %c1_i32 = arith.constant 1 : i32
    %2 = arith.addi %1, %c1_i32 : i32
    %c7_i32 = arith.constant 7 : i32
    %3 = arith.minsi %2, %c7_i32 : i32
    %c1_i32_0 = arith.constant 1 : i32
    %4 = arith.muli %3, %c1_i32_0 : i32
    %5 = arith.addi %4, %arg0 : i32
    %c0_i32 = arith.constant 0 : i32
    %c0_i32_1 = arith.constant 0 : i32
    return %c0_i32, %5 : i32, i32
  }
  func.func @transform_2(%arg0: i32, %arg1: i32, %arg2: memref<16xi32, #tpu.memory_space<smem>>) -> (i32, i32) {
    %0 = arith.index_cast %arg1 : i32 to index
    %1 = memref.load %arg2[%0] : memref<16xi32, #tpu.memory_space<smem>>
    %c1_i32 = arith.constant 1 : i32
    %2 = arith.muli %1, %c1_i32 : i32
    %3 = arith.addi %2, %arg0 : i32
    %c0_i32 = arith.constant 0 : i32
    %c0_i32_0 = arith.constant 0 : i32
    return %c0_i32, %3 : i32, i32
  }
  func.func @transform_3(%arg0: i32, %arg1: i32, %arg2: memref<16xi32, #tpu.memory_space<smem>>) -> (i32, i32) {
    %0 = arith.index_cast %arg1 : i32 to index
    %1 = memref.load %arg2[%0] : memref<16xi32, #tpu.memory_space<smem>>
    %c1_i32 = arith.constant 1 : i32
    %2 = arith.addi %1, %c1_i32 : i32
    %c7_i32 = arith.constant 7 : i32
    %3 = arith.minsi %2, %c7_i32 : i32
    %c1_i32_0 = arith.constant 1 : i32
    %4 = arith.muli %3, %c1_i32_0 : i32
    %5 = arith.addi %4, %arg0 : i32
    %c0_i32 = arith.constant 0 : i32
    %c0_i32_1 = arith.constant 0 : i32
    return %c0_i32, %5 : i32, i32
  }
  func.func @transform_4(%arg0: i32, %arg1: i32, %arg2: memref<16xi32, #tpu.memory_space<smem>>) -> (i32, i32) {
    %c0_i32 = arith.constant 0 : i32
    %c0_i32_0 = arith.constant 0 : i32
    %c0_i32_1 = arith.constant 0 : i32
    return %c0_i32, %c0_i32_0 : i32, i32
  }
  func.func @transform_5(%arg0: i32, %arg1: i32, %arg2: memref<16xi32, #tpu.memory_space<smem>>) -> (i32, i32) {
    %c0_i32 = arith.constant 0 : i32
    %c0_i32_0 = arith.constant 0 : i32
    %c0_i32_1 = arith.constant 0 : i32
    return %c0_i32, %c0_i32_0 : i32, i32
  }
  func.func @transform_6(%arg0: i32, %arg1: i32, %arg2: memref<16xi32, #tpu.memory_space<smem>>) -> (i32, i32) {
    %c1_i32 = arith.constant 1 : i32
    %0 = arith.muli %arg1, %c1_i32 : i32
    %1 = arith.addi %0, %arg0 : i32
    %c0_i32 = arith.constant 0 : i32
    %c0_i32_0 = arith.constant 0 : i32
    return %c0_i32, %1 : i32, i32
  }
}

</mosaic_0001>

<bundles_post_ra>
// kernel: squeeze.3
= control target key start
LH: loop header
LB: loop body
LE: loop exit
PB: predicated region body
PF: predicated region fallthrough
CT: control target
= control target key end

     0   :  { %vm6_vm0 = vcmask 1043458   ;;  %vm10_vm1 = vcmask 1045508   ;;  %vm14_vm2 = vcmask 1047558   ;;  %s20_s6 = smov 3  ;;  %s23_s7 = smov 12  ;;  %vm16_vm3 = vcmask 64512   ;;  %s788_s0 = inlined_call_operand.vmem [shape: f32[1,1,8,16,8], index: 0, kind: input, shape index: {}]   ;;  %s789_s1 = inlined_call_operand.vmem [shape: f32[1,1024], index: 1, kind: output, shape index: {}]  }
   0x1   :  { %v417_v0 = vld [vmem:[%s788_s0 + $0xf] ss:$16 sm:%s20_s6]   ;;  %s28_s12 = smov 48  ;;  %s33_s13 = smov 192  ;;  %vm39_vm4 = vcmask 1048512   ;;  %vm62_vm5 = vcmask 982912  }
   0x2   :  { %v418_v1 = vld [vmem:[%s788_s0 + $0xf] ss:$16 sm:%s23_s7]   ;;  %s66_s18 = smov 3  ;;  %s69_s21 = smov 12  ;;  %vm85_vm6 = vcmask 917312   ;;  %vm108_vm7 = vcmask 851712  }
   0x3   :  { %v26_v2 = vsel %vm6_vm0, %v418_v1, %v417_v0  ;;  %v419_v3 = vld [vmem:[%s788_s0 + $0xf] ss:$16 sm:%s28_s12]   ;;  %v425_v6 = vld [vmem:[%s788_s0 + $0xd] ss:$16 sm:%s66_s18]   ;;  %s74_s22 = smov 48  ;;  %s79_s27 = smov 192 }
   0x4   :  { %v420_v4 = vld [vmem:[%s788_s0 + $0xf] ss:$16 sm:%s33_s13]   ;;  %v31_v5 = vsel %vm10_vm1, %v419_v3, %v26_v2  ;;  %v426_v8 = vld [vmem:[%s788_s0 + $0xd] ss:$16 sm:%s69_s21]   ;;  %s499_s28 = smov 120   ;;  %s43_s2 = smov 3 }
   0x5   :  { %v36_v7 = vsel %vm14_vm2, %v420_v4, %v31_v5  ;;  %v427_v9 = vld [vmem:[%s788_s0 + $0xd] ss:$16 sm:%s74_s22]   ;;  %v72_v10 = vsel %vm6_vm0, %v426_v8, %v425_v6  ;;  %s46_s3 = smov 12  ;;  %v421_v13 = vld [vmem:[%s788_s0 + $0xe] ss:$16 sm:%s43_s2]   ;;  %s51_s8 = smov 48 }
   0x6   :  { %37 = vrot.lane.b32.xlu0 %v36_v7, %s499_s28  ;;  %v428_v11 = vld [vmem:[%s788_s0 + $0xd] ss:$16 sm:%s79_s27]   ;;  %v77_v12 = vsel %vm10_vm1, %v427_v9, %v72_v10  ;;  %s56_s9 = smov 192  ;;  %s89_s14 = smov 3  ;;  %vm131_vm8 = vcmask 786112   ;;  %vm154_vm9 = vcmask 720512  }
   0x7   :  { %v422_v14 = vld [vmem:[%s788_s0 + $0xe] ss:$16 sm:%s46_s3]   ;;  %v82_v15 = vsel %vm14_vm2, %v428_v11, %v77_v12  ;;  %s500_s15 = smov 104   ;;  %v429_v20 = vld [vmem:[%s788_s0 + $0xc] ss:$16 sm:%s89_s14]   ;;  %s92_s18 = smov 12 }
   0x8   :  { %v49_v16 = vsel %vm6_vm0, %v422_v14, %v421_v13  ;;  %v423_v17 = vld [vmem:[%s788_s0 + $0xe] ss:$16 sm:%s51_s8]   ;;  %83 = vrot.lane.b32.xlu1 %v82_v15, %s500_s15  ;;  %s97_s19 = smov 48  ;;  %s102_s24 = smov 192  ;;  %vm177_vm10 = vcmask 654912   ;;  %vm200_vm11 = vcmask 589312  }
   0x9   :  { %v424_v18 = vld [vmem:[%s788_s0 + $0xe] ss:$16 sm:%s56_s9]   ;;  %v54_v19 = vsel %vm10_vm1, %v423_v17, %v49_v16  ;;  %v430_v22 = vld [vmem:[%s788_s0 + $0xc] ss:$16 sm:%s92_s18]   ;;  %s501_s25 = smov 112   ;;  %s112_s28 = smov 3 }
   0xa   :  { %v59_v21 = vsel %vm14_vm2, %v424_v18, %v54_v19  ;;  %v431_v23 = vld [vmem:[%s788_s0 + $0xc] ss:$16 sm:%s97_s19]   ;;  %v95_v24 = vsel %vm6_vm0, %v430_v22, %v429_v20  ;;  %s115_s29 = smov 12  ;;  %v433_v27 = vld [vmem:[%s788_s0 + $0xb] ss:$16 sm:%s112_s28]   ;;  %s120_s5 = smov 48 }
   0xb   :  { %60 = vrot.lane.b32.xlu0 %v59_v21, %s501_s25  ;;  %v432_v25 = vld [vmem:[%s788_s0 + $0xc] ss:$16 sm:%s102_s24]   ;;  %v100_v26 = vsel %vm10_vm1, %v431_v23, %v95_v24  ;;  %s125_s6 = smov 192  ;;  %s135_s11 = smov 3  ;;  %vm223_vm12 = vcmask 523712   ;;  %vm246_vm13 = vcmask 458112  }
   0xc   :  { %v434_v28 = vld [vmem:[%s788_s0 + $0xb] ss:$16 sm:%s115_s29]   ;;  %v105_v29 = vsel %vm14_vm2, %v432_v25, %v100_v26  ;;  %s502_s12 = smov 96   ;;  %v437_v34 = vld [vmem:[%s788_s0 + $0xa] ss:$16 sm:%s135_s11]   ;;  %s138_s15 = smov 12 }
   0xd   :  { %v118_v30 = vsel %vm6_vm0, %v434_v28, %v433_v27  ;;  %v435_v31 = vld [vmem:[%s788_s0 + $0xb] ss:$16 sm:%s120_s5]   ;;  %106 = vrot.lane.b32.xlu1 %v105_v29, %s502_s12  ;;  %s143_s16 = smov 48  ;;  %s148_s21 = smov 192  ;;  %vm269_vm14 = vcmask 392512   ;;  %vm292_vm15 = vcmask 326912  }
   0xe   :  { %v436_v32 = vld [vmem:[%s788_s0 + $0xb] ss:$16 sm:%s125_s6]   ;;  %v123_v33 = vsel %vm10_vm1, %v435_v31, %v118_v30  ;;  %v438_v36 = vld [vmem:[%s788_s0 + $0xa] ss:$16 sm:%s138_s15]   ;;  %s503_s22 = smov 88   ;;  %s158_s25 = smov 3 }
   0xf   :  { %v128_v35 = vsel %vm14_vm2, %v436_v32, %v123_v33  ;;  %v439_v37 = vld [vmem:[%s788_s0 + $0xa] ss:$16 sm:%s143_s16]   ;;  %v141_v38 = vsel %vm6_vm0, %v438_v36, %v437_v34  ;;  %s161_s26 = smov 12  ;;  %v441_v41 = vld [vmem:[%s788_s0 + $0x9] ss:$16 sm:%s158_s25]   ;;  %s166_s2 = smov 48 }
  0x10   :  { %129 = vrot.lane.b32.xlu0 %v128_v35, %s503_s22  ;;  %v440_v39 = vld [vmem:[%s788_s0 + $0xa] ss:$16 sm:%s148_s21]   ;;  %v146_v40 = vsel %vm10_vm1, %v439_v37, %v141_v38  ;;  %s171_s3 = smov 192  ;;  %s181_s8 = smov 3 }
  0x11   :  { %v442_v42 = vld [vmem:[%s788_s0 + $0x9] ss:$16 sm:%s161_s26]   ;;  %v151_v43 = vsel %vm14_vm2, %v440_v39, %v146_v40  ;;  %s504_s9 = smov 80   ;;  %v445_v48 = vld [vmem:[%s788_s0 + $0x8] ss:$16 sm:%s181_s8]   ;;  %s184_s12 = smov 12 }
  0x12   :  { %v164_v44 = vsel %vm6_vm0, %v442_v42, %v441_v41  ;;  %v443_v45 = vld [vmem:[%s788_s0 + $0x9] ss:$16 sm:%s166_s2]   ;;  %152 = vrot.lane.b32.xlu1 %v151_v43, %s504_s9  ;;  %s189_s13 = smov 48  ;;  %s194_s18 = smov 192 }
  0x13   :  { %v444_v46 = vld [vmem:[%s788_s0 + $0x9] ss:$16 sm:%s171_s3]   ;;  %v169_v47 = vsel %vm10_vm1, %v443_v45, %v164_v44  ;;  %v446_v50 = vld [vmem:[%s788_s0 + $0x8] ss:$16 sm:%s184_s12]   ;;  %s505_s19 = smov 72   ;;  %s204_s22 = smov 3 }
  0x14   :  { %v174_v49 = vsel %vm14_vm2, %v444_v46, %v169_v47  ;;  %v447_v51 = vld [vmem:[%s788_s0 + $0x8] ss:$16 sm:%s189_s13]   ;;  %v187_v52 = vsel %vm6_vm0, %v446_v50, %v445_v48  ;;  %s207_s23 = smov 12  ;;  %v449_v55 = vld [vmem:[%s788_s0 + $0x7] ss:$16 sm:%s204_s22]   ;;  %s212_s28 = smov 48 }
  0x15   :  { %175 = vrot.lane.b32.xlu0 %v174_v49, %s505_s19  ;;  %v448_v53 = vld [vmem:[%s788_s0 + $0x8] ss:$16 sm:%s194_s18]   ;;  %v192_v54 = vsel %vm10_vm1, %v447_v51, %v187_v52  ;;  %s217_s29 = smov 192  ;;  %s227_s5 = smov 3 }
  0x16   :  { %v450_v56 = vld [vmem:[%s788_s0 + $0x7] ss:$16 sm:%s207_s23]   ;;  %v197_v57 = vsel %vm14_vm2, %v448_v53, %v192_v54  ;;  %s506_s6 = smov 64   ;;  %v453_v62 = vld [vmem:[%s788_s0 + $0x6] ss:$16 sm:%s227_s5]   ;;  %s230_s9 = smov 12 }
  0x17   :  { %v210_v58 = vsel %vm6_vm0, %v450_v56, %v449_v55  ;;  %v451_v59 = vld [vmem:[%s788_s0 + $0x7] ss:$16 sm:%s212_s28]   ;;  %198 = vrot.lane.b32.xlu1 %v197_v57, %s506_s6  ;;  %s235_s10 = smov 48  ;;  %s240_s15 = smov 192 }
  0x18   :  { %v452_v60 = vld [vmem:[%s788_s0 + $0x7] ss:$16 sm:%s217_s29]   ;;  %v215_v61 = vsel %vm10_vm1, %v451_v59, %v210_v58  ;;  %v454_v0 = vld [vmem:[%s788_s0 + $0x6] ss:$16 sm:%s230_s9]   ;;  %s507_s16 = smov 56   ;;  %s250_s19 = smov 3 }
  0x19   :  { %v220_v63 = vsel %vm14_vm2, %v452_v60, %v215_v61  ;;  %v455_v1 = vld [vmem:[%s788_s0 + $0x6] ss:$16 sm:%s235_s10]   ;;  %v233_v2 = vsel %vm6_vm0, %v454_v0, %v453_v62  ;;  %s253_s20 = smov 12  ;;  %v457_v5 = vld [vmem:[%s788_s0 + $0x5] ss:$16 sm:%s250_s19]   ;;  %s258_s25 = smov 48 }
  0x1a   :  { %221 = vrot.lane.b32.xlu0 %v220_v63, %s507_s16  ;;  %v456_v3 = vld [vmem:[%s788_s0 + $0x6] ss:$16 sm:%s240_s15]   ;;  %v238_v4 = vsel %vm10_vm1, %v455_v1, %v233_v2  ;;  %s263_s26 = smov 192  ;;  %s273_s2 = smov 3 }
  0x1b   :  { %v458_v6 = vld [vmem:[%s788_s0 + $0x5] ss:$16 sm:%s253_s20]   ;;  %v243_v7 = vsel %vm14_vm2, %v456_v3, %v238_v4  ;;  %s508_s3 = smov 48   ;;  %v461_v12 = vld [vmem:[%s788_s0 + $0x4] ss:$16 sm:%s273_s2]   ;;  %s276_s6 = smov 12 }
  0x1c   :  { %v256_v8 = vsel %vm6_vm0, %v458_v6, %v457_v5  ;;  %v459_v9 = vld [vmem:[%s788_s0 + $0x5] ss:$16 sm:%s258_s25]   ;;  %244 = vrot.lane.b32.xlu1 %v243_v7, %s508_s3  ;;  %s281_s7 = smov 48  ;;  %s286_s12 = smov 192 }
  0x1d   :  { %v460_v10 = vld [vmem:[%s788_s0 + $0x5] ss:$16 sm:%s263_s26]   ;;  %v261_v11 = vsel %vm10_vm1, %v459_v9, %v256_v8  ;;  %v462_v14 = vld [vmem:[%s788_s0 + $0x4] ss:$16 sm:%s276_s6]   ;;  %s509_s13 = smov 40   ;;  %s296_s16 = smov 3 }
  0x1e   :  { %v266_v13 = vsel %vm14_vm2, %v460_v10, %v261_v11  ;;  %v463_v15 = vld [vmem:[%s788_s0 + $0x4] ss:$16 sm:%s281_s7]   ;;  %v279_v16 = vsel %vm6_vm0, %v462_v14, %v461_v12  ;;  %s299_s17 = smov 12  ;;  %v465_v19 = vld [vmem:[%s788_s0 + $0x3] ss:$16 sm:%s296_s16]   ;;  %s304_s22 = smov 48 }
  0x1f   :  { %267 = vrot.lane.b32.xlu0 %v266_v13, %s509_s13  ;;  %v464_v17 = vld [vmem:[%s788_s0 + $0x4] ss:$16 sm:%s286_s12]   ;;  %v284_v18 = vsel %vm10_vm1, %v463_v15, %v279_v16  ;;  %s309_s23 = smov 192  ;;  %s319_s28 = smov 3 }
  0x20   :  { %v466_v20 = vld [vmem:[%s788_s0 + $0x3] ss:$16 sm:%s299_s17]   ;;  %v289_v21 = vsel %vm14_vm2, %v464_v17, %v284_v18  ;;  %s510_s29 = smov 32   ;;  %v469_v26 = vld [vmem:[%s788_s0 + $0x2] ss:$16 sm:%s319_s28]   ;;  %s322_s3 = smov 12 }
  0x21   :  { %v302_v22 = vsel %vm6_vm0, %v466_v20, %v465_v19  ;;  %v467_v23 = vld [vmem:[%s788_s0 + $0x3] ss:$16 sm:%s304_s22]   ;;  %290 = vrot.lane.b32.xlu1 %v289_v21, %s510_s29  ;;  %s327_s4 = smov 48  ;;  %s332_s9 = smov 192 }
  0x22   :  { %v468_v24 = vld [vmem:[%s788_s0 + $0x3] ss:$16 sm:%s309_s23]   ;;  %v307_v25 = vsel %vm10_vm1, %v467_v23, %v302_v22  ;;  %v470_v28 = vld [vmem:[%s788_s0 + $0x2] ss:$16 sm:%s322_s3]   ;;  %s511_s10 = smov 24   ;;  %s342_s13 = smov 3 }
  0x23   :  { %v312_v27 = vsel %vm14_vm2, %v468_v24, %v307_v25  ;;  %v471_v29 = vld [vmem:[%s788_s0 + $0x2] ss:$16 sm:%s327_s4]   ;;  %v325_v30 = vsel %vm6_vm0, %v470_v28, %v469_v26  ;;  %s345_s14 = smov 12  ;;  %v473_v33 = vld [vmem:[%s788_s0 + $0x1] ss:$16 sm:%s342_s13]   ;;  %s350_s19 = smov 48 }
  0x24   :  { %313 = vrot.lane.b32.xlu0 %v312_v27, %s511_s10  ;;  %v472_v31 = vld [vmem:[%s788_s0 + $0x2] ss:$16 sm:%s332_s9]   ;;  %v330_v32 = vsel %vm10_vm1, %v471_v29, %v325_v30  ;;  %s355_s20 = smov 192  ;;  %s8_s25 = smov 48 }
  0x25   :  { %v474_v34 = vld [vmem:[%s788_s0 + $0x1] ss:$16 sm:%s345_s14]   ;;  %v335_v35 = vsel %vm14_vm2, %v472_v31, %v330_v32  ;;  %s512_s26 = smov 16   ;;  %v9_v40 = vld [vmem:[%s788_s0] ss:$16 sm:%s8_s25]   ;;  %s12_s29 = smov 192 }
  0x26   :  { %v348_v36 = vsel %vm6_vm0, %v474_v34, %v473_v33  ;;  %v475_v37 = vld [vmem:[%s788_s0 + $0x1] ss:$16 sm:%s350_s19]   ;;  %336 = vrot.lane.b32.xlu1 %v335_v35, %s512_s26  ;;  %s2_s30 = smov 3  ;;  %s4_s6 = smov 12 }
  0x27   :  { %v476_v38 = vld [vmem:[%s788_s0 + $0x1] ss:$16 sm:%s355_s20]   ;;  %v353_v39 = vsel %vm10_vm1, %v475_v37, %v348_v36  ;;  %v13_v42 = vld [vmem:[%s788_s0] ss:$16 sm:%s12_s29]   ;;  %s513_s7 = smov 8  }
  0x28   :  { %v358_v41 = vsel %vm14_vm2, %v476_v38, %v353_v39  ;;  %v3_v43 = vld [vmem:[%s788_s0] ss:$16 sm:%s2_s30]  }
  0x29   :  { %359 = vrot.lane.b32.xlu0 %v358_v41, %s513_s7  ;;  %v5_v44 = vld [vmem:[%s788_s0] ss:$16 sm:%s4_s6]  }
  0x2a   :  { %v7_v45 = vsel %vm6_vm0, %v5_v44, %v3_v43  ;;  %vm315_vm0 = vcmask 261312  }
  0x2b   :  { %v11_v46 = vsel %vm10_vm1, %v9_v40, %v7_v45  ;;  %vm338_vm1 = vcmask 195712  }
  0x2c   :  { %v15_v47 = vsel %vm14_vm2, %v13_v42, %v11_v46  ;;  %vm361_vm2 = vcmask 130112  }
  0x2d   :  { %17 = vst.msk [vmem:[#allocation0] ss:$8 sm:$0xf] %vm16_vm3, %v15_v47   ;;  %18 = vst.msk [vmem:[#allocation0] ss:$8 sm:$0xf0] %vm16_vm3, %v15_v47  }
  0x78   :  { %v38_v48 = vpop.permute.xlu0 %37  }
  0x79   :  { %40 = vst.msk [vmem:[#allocation0] ss:$8 sm:$0xf] %vm39_vm4, %v38_v48   ;;  %41 = vst.msk [vmem:[#allocation0] ss:$8 sm:$0xf0] %vm39_vm4, %v38_v48  }
  0x7a   :  { %v84_v49 = vpop.permute.xlu1 %83  }
  0x7d   :  { %v61_v50 = vpop.permute.xlu0 %60  }
  0x7e   :  { %63 = vst.msk [vmem:[#allocation0] ss:$8 sm:$0xf] %vm62_vm5, %v61_v50   ;;  %64 = vst.msk [vmem:[#allocation0] ss:$8 sm:$0xf0] %vm62_vm5, %v61_v50  }
  0x7f   :  { %86 = vst.msk [vmem:[#allocation0] ss:$8 sm:$0xf] %vm85_vm6, %v84_v49   ;;  %87 = vst.msk [vmem:[#allocation0] ss:$8 sm:$0xf0] %vm85_vm6, %v84_v49   ;;  %v107_v51 = vpop.permute.xlu1 %106  }
  0x80   :  { %109 = vst.msk [vmem:[#allocation0] ss:$8 sm:$0xf] %vm108_vm7, %v107_v51   ;;  %110 = vst.msk [vmem:[#allocation0] ss:$8 sm:$0xf0] %vm108_vm7, %v107_v51  }
  0x82   :  { %v130_v52 = vpop.permute.xlu0 %129  }
  0x83   :  { %132 = vst.msk [vmem:[#allocation0] ss:$8 sm:$0xf] %vm131_vm8, %v130_v52   ;;  %133 = vst.msk [vmem:[#allocation0] ss:$8 sm:$0xf0] %vm131_vm8, %v130_v52  }
  0x84   :  { %v153_v53 = vpop.permute.xlu1 %152  }
  0x85   :  { %155 = vst.msk [vmem:[#allocation0] ss:$8 sm:$0xf] %vm154_vm9, %v153_v53   ;;  %156 = vst.msk [vmem:[#allocation0] ss:$8 sm:$0xf0] %vm154_vm9, %v153_v53  }
  0x87   :  { %v176_v54 = vpop.permute.xlu0 %175  }
  0x88   :  { %178 = vst.msk [vmem:[#allocation0] ss:$8 sm:$0xf] %vm177_vm10, %v176_v54   ;;  %179 = vst.msk [vmem:[#allocation0] ss:$8 sm:$0xf0] %vm177_vm10, %v176_v54  }
  0x89   :  { %v199_v55 = vpop.permute.xlu1 %198  }
  0x8a   :  { %201 = vst.msk [vmem:[#allocation0] ss:$8 sm:$0xf] %vm200_vm11, %v199_v55   ;;  %202 = vst.msk [vmem:[#allocation0] ss:$8 sm:$0xf0] %vm200_vm11, %v199_v55  }
  0x8c   :  { %v222_v56 = vpop.permute.xlu0 %221  }
  0x8d   :  { %224 = vst.msk [vmem:[#allocation0] ss:$8 sm:$0xf] %vm223_vm12, %v222_v56   ;;  %225 = vst.msk [vmem:[#allocation0] ss:$8 sm:$0xf0] %vm223_vm12, %v222_v56  }
  0x8e   :  { %v245_v57 = vpop.permute.xlu1 %244  }
  0x8f   :  { %247 = vst.msk [vmem:[#allocation0] ss:$8 sm:$0xf] %vm246_vm13, %v245_v57   ;;  %248 = vst.msk [vmem:[#allocation0] ss:$8 sm:$0xf0] %vm246_vm13, %v245_v57  }
  0x91   :  { %v268_v58 = vpop.permute.xlu0 %267  }
  0x92   :  { %270 = vst.msk [vmem:[#allocation0] ss:$8 sm:$0xf] %vm269_vm14, %v268_v58   ;;  %271 = vst.msk [vmem:[#allocation0] ss:$8 sm:$0xf0] %vm269_vm14, %v268_v58  }
  0x93   :  { %v291_v59 = vpop.permute.xlu1 %290  }
  0x94   :  { %293 = vst.msk [vmem:[#allocation0] ss:$8 sm:$0xf] %vm292_vm15, %v291_v59   ;;  %294 = vst.msk [vmem:[#allocation0] ss:$8 sm:$0xf0] %vm292_vm15, %v291_v59  }
  0x96   :  { %v314_v60 = vpop.permute.xlu0 %313  }
  0x97   :  { %316 = vst.msk [vmem:[#allocation0] ss:$8 sm:$0xf] %vm315_vm0, %v314_v60   ;;  %317 = vst.msk [vmem:[#allocation0] ss:$8 sm:$0xf0] %vm315_vm0, %v314_v60  }
  0x98   :  { %v337_v61 = vpop.permute.xlu1 %336  }
  0x99   :  { %339 = vst.msk [vmem:[#allocation0] ss:$8 sm:$0xf] %vm338_vm1, %v337_v61   ;;  %340 = vst.msk [vmem:[#allocation0] ss:$8 sm:$0xf0] %vm338_vm1, %v337_v61  }
  0x9b   :  { %v360_v62 = vpop.permute.xlu0 %359  }
  0x9c   :  { %362 = vst.msk [vmem:[#allocation0] ss:$8 sm:$0xf] %vm361_vm2, %v360_v62   ;;  %363 = vst.msk [vmem:[#allocation0] ss:$8 sm:$0xf0] %vm361_vm2, %v360_v62  }
  0xa3   :  { %v367_v63 = vld [vmem:[#allocation0] sm:$0x1]  ;;  %v371_v0 = vld [vmem:[#allocation0 + $0x8] sm:$0x1]  ;;  %v376_v1 = vld [vmem:[#allocation0 + $0x10] sm:$0x1] }
  0xa4   :  { %369 = vst [vmem:[%s789_s1] sm:$0x1] %v367_v63  ;;  %477 = vst [vmem:[%s789_s1 + $0x1] sm:$0x1] %v371_v0  ;;  %v382_v2 = vld [vmem:[#allocation0 + $0x18] sm:$0x1] }
  0xa5   :  { %478 = vst [vmem:[%s789_s1 + $0x2] sm:$0x1] %v376_v1  ;;  %v388_v3 = vld [vmem:[#allocation0 + $0x20] sm:$0x1]  ;;  %v394_v4 = vld [vmem:[#allocation0 + $0x28] sm:$0x1] }
  0xa6   :  { %479 = vst [vmem:[%s789_s1 + $0x3] sm:$0x1] %v382_v2  ;;  %480 = vst [vmem:[%s789_s1 + $0x4] sm:$0x1] %v388_v3  ;;  %v400_v5 = vld [vmem:[#allocation0 + $0x30] sm:$0x1] }
  0xa7   :  { %481 = vst [vmem:[%s789_s1 + $0x5] sm:$0x1] %v394_v4  ;;  %v406_v6 = vld [vmem:[#allocation0 + $0x38] sm:$0x1]  ;;  %482 = vst [vmem:[%s789_s1 + $0x6] sm:$0x1] %v400_v5 }
  0xa8   :  { %483 = vst [vmem:[%s789_s1 + $0x7] sm:$0x1] %v406_v6 }

// kernel: header_v5_forward.1
= control target key start
LH: loop header
LB: loop body
LE: loop exit
PB: predicated region body
PF: predicated region fallthrough
CT: control target
= control target key end

     0   :  { %s1239_s0 = inlined_call_operand.vmem [shape: s32[16], index: 0, kind: input, shape index: {}]   ;;  %s1240_s1 = inlined_call_operand.vmem [shape: f32[32,1024], index: 1, kind: input, shape index: {}, may-alias: {1,2}]   ;;  %s1241_s2 = inlined_call_operand.vmem [shape: f32[32,1024], index: 2, kind: input, shape index: {}, may-alias: {1,2}]   ;;  %s1242_s3 = inlined_call_operand.vmem [shape: f32[1,1024], index: 3, kind: input, shape index: {}, may-alias: {3,4}]   ;;  %s1243_s4 = inlined_call_operand.vmem [shape: f32[1,1024], index: 4, kind: input, shape index: {}, may-alias: {3,4}]   ;;  %s1244_s5 = inlined_call_operand.vmem [shape: f32[16,32], index: 5, kind: input, shape index: {}]   ;;  %s1245_s6 = inlined_call_operand.vmem [shape: f32[16,1], index: 6, kind: input, shape index: {}]   ;;  %s1246_s7 = inlined_call_operand.vmem [shape: f32[16,2048], index: 7, kind: output, shape index: {}]  }
   0x1   :  { %1248 = sst [smem:[#allocation9_spill]] %s1242_s3  ;;  %s12_s26 = sshll.u32 %s1239_s0, 4  ;;  %s13_s26 = int_to_ptr.vmem [resolvable:$true] %s12_s26 }
   0x2   :  { %1249 = sst [smem:[#allocation10_spill]] %s1243_s4  ;;  %s932_s27 = scalar_lea.vmem %s13_s26, 16 }
   0x3   :  { %1250 = sst [smem:[#allocation11_spill]] %s1246_s7  ;;  %p933_p0 = scmp.ne.s32.totalorder %s13_s26, %s932_s27 }
   0x4   :  { %p937_p1 = scmp.lt.s32.totalorder %s13_s26, %s13_s26  ;;  %p938_p2 = scmp.lt.s32.totalorder %s932_s27, %s932_s27 }
   0x6   :  { %p939_p3 = por %p938_p2, %p937_p1 }
   0x8   :  { %p940_p4 = pnand %p939_p3, %p933_p0 }
   0xa   :  { %943 = shalt.err (!%p940_p4)  }
   0xb   :  { %s1018_s28 = smov [#allocation3]  }
   0xc   :  { %15 = dma.vmem_to_smem %s13_s26, 16, %s1018_s28, [#allocation2] }
   0xd   :  { %980 = dma.done.wait [#allocation2], 16 }
   0xe   :  { %981 = vsyncadd [#allocation2], 4294967280 }
   0xf   :  { %17 = sfence }
  0x10   :  { %s1063_s29 = smov 0   ;;  %s1065_s30 = smov 0  }
  0x11   :  { %s1067_s8 = smov 0   ;;  %s1069_s0 = smov 0  }
  0x12   :  { %s1071_s9 = smov 0   ;;  %s1073_s10 = smov 0  }
  0x13   :  { %s1075_s11 = smov 0   ;;  %s1077_s12 = smov 0  }
  0x14   :  { %s1079_s13 = smov 0  }
  0x15 LB: > { %s32_s14 = sadd.s32 1, %s1012_s12  ;;  %s809_s15 = sadd.s32 4294967295, %s1016_s13   ;;  %s1016_s13 = sphi %s1079_s13, %s23_s13   ;;  %s1012_s12 = sphi %s1077_s12, %s1267_s12   ;;  %s1008_s11 = sphi %s1075_s11, %s1266_s11   ;;  %s1004_s10 = sphi %s1073_s10, %s1265_s10   ;;  %s1000_s9 = sphi %s1071_s9, %s1264_s9   ;;  %s996_s0 = sphi %s1069_s0, %s1263_s0   ;;  %s992_s8 = sphi %s1067_s8, %s1262_s8   ;;  %s988_s30 = sphi %s1065_s30, %s1261_s30   ;;  %s984_s29 = sphi %s1063_s29, %s1260_s29  }
  0x16   : > { %p33_p5 = scmp.ge.s32.totalorder %s32_s14, 16  ;;  %s39_s16 = sld [smem:[#allocation3 + %s1012_s12]] }
  0x17   : > { %p53_p6 = scmp.ne.s32.totalorder %s1004_s10, %s1000_s9  ;;  %p54_p7 = scmp.eq.s32.totalorder %s1016_s13, 0 }
  0x18   : > { %s1269_s14 = smov (%p33_p5, %s32_s14), 0  ;;  %s69_s17 = sld [smem:[#allocation3 + %s1012_s12]] }
  0x19   : > { %1251 = sst [smem:[#allocation8_spill]] %s1269_s14  ;;  %s46_s20 = sadd.s32 1, %s1004_s10 }
  0x1a   : > { %s41_s18 = sld [smem:[#allocation3 + %s1269_s14]]  ;;  %p1120_p8 = por %p54_p7, %p53_p6 }
  0x1b   : > { %s74_s19 = sld [smem:[#allocation3 + %s1269_s14]]  ;;  %p89_p9 = scmp.ne.s32.totalorder %s996_s0, %s992_s8 }
  0x1c   : > { %s215_s22 = ssub.s32 %s1012_s12, %s1269_s14  ;;  %s218_s24 = sadd.s32 1, %s988_s30 }
  0x1d   : > { %p1128_p10 = scmp.eq.s32.totalorder %s215_s22, 0  ;;  %p1133_p11 = por %p89_p9, %p54_p7 }
  0x1e   : > { %p228_p12 = scmp.ne.s32.totalorder %s988_s30, %s984_s29  ;;  %s70_s26 = sadd.s32 1, %s69_s17 }
  0x1f   : > { %p229_p13 = scmp.eq.s32.totalorder %s809_s15, 15  ;;  %p71_p0 = scmp.lt.s32.totalorder %s70_s26, 7 }
  0x20   : > { %s43_s27 = ssub.s32 %s39_s16, %s41_s18  ;;  %s82_s3 = sadd.s32 1, %s996_s0 }
  0x21   : > { %p44_p1 = scmp.eq.s32.totalorder %s43_s27, 0  ;;  %s75_s28 = sadd.s32 1, %s74_s19 }
  0x22   : > { %s1271_s26 = smov (!%p71_p0, %s70_s26), 7  ;;  %p76_p2 = scmp.lt.s32.totalorder %s75_s28, 7 }
  0x23   : > { %s1140_s22 = scalar_select %p44_p1, %s1004_s10, %s46_s20  }
  0x24   : > { %p1142_p3 = por %p229_p13, %p228_p12  ;;  %s1273_s28 = smov (!%p76_p2, %s75_s28), 7 }
  0x25   : > { %s1149_s7 = scalar_select %p1128_p10, %s988_s30, %s218_s24  }
  0x26   : > { %s79_s4 = ssub.s32 %s1271_s26, %s1273_s28  ;;  %p812_p5 = scmp.ge.s32.totalorder %s1016_s13, 16 }
  0x27   : > { %p80_p4 = scmp.eq.s32.totalorder %s79_s4, 0 }
  0x28   : > { %257 = sbr.rel (%p812_p5) target bundleno = 78 (0x4e), region = 24 }
  0x29   : > { %s1153_s15 = scalar_select %p80_p4, %s996_s0, %s82_s3  }
  0x2f   : > { %260 = sbr.rel (!%p1120_p8) target bundleno = 61 (0x3d), region = 28  ;;  %s262_s16 = sand.u32 (%p1120_p8), 1, %s1004_s10  }
  0x30   : > { %s265_s17 = sld [smem:[#allocation3 + %s1012_s12]] (%p1120_p8)  ;;  %s813_s18 = sshll.u32 (%p1120_p8), %s262_s16, 5 }
  0x31   : > { %s264_s3 = scalar_lea.vmem (%p1120_p8), [#allocation4], %s813_s18 }
  0x36   : > { %s814_s19 = sshll.u32 %s265_s17, 3 }
  0x37   : > { %s268_s24 = scalar_lea.vmem %s1240_s1, %s814_s19 }
  0x38   : > { %v302_v0 = vld [vmem:[%s268_s24] sm:$0xff] }
  0x39   : > { %v304_v1 = vld [vmem:[%s268_s24 + $0x40] sm:$0xff]  ;;  %303 = vst [vmem:[%s264_s3] sm:$0xff] %v302_v0 }
  0x3a   : > { %v306_v2 = vld [vmem:[%s268_s24 + $0x80] sm:$0xff]  ;;  %305 = vst [vmem:[%s264_s3 + $0x8] sm:$0xff] %v304_v1 }
  0x3b   : > { %307 = vst [vmem:[%s264_s3 + $0x10] sm:$0xff] %v306_v2  ;;  %v308_v3 = vld [vmem:[%s268_s24 + $0xc0] sm:$0xff] }
  0x3c   : > { %309 = vst [vmem:[%s264_s3 + $0x18] sm:$0xff] %v308_v3 }
  0x3d PF: > { %315 = sbr.rel (!%p1133_p11) target bundleno = 78 (0x4e), region = 66  ;;  %s320_s4 = sld [smem:[#allocation3 + %s1012_s12]] (%p1133_p11) }
  0x3e   : > { %s317_s21 = sand.u32 (%p1133_p11), 1, %s996_s0  }
  0x3f   : > { %s815_s27 = sshll.u32 (%p1133_p11), %s317_s21, 5 }
  0x40   : > { %s319_s19 = scalar_lea.vmem (%p1133_p11), [#allocation5], %s815_s27 }
  0x43   : > { %s321_s26 = sadd.s32 (%p1133_p11), 1, %s320_s4 }
  0x44   : > { %p322_p6 = scmp.lt.s32.totalorder %s321_s26, 7 }
  0x46   : > { %s1275_s26 = smov (!%p322_p6, %s321_s26), 7 }
  0x47   : > { %s816_s28 = sshll.u32 %s1275_s26, 3 }
  0x48   : > { %s326_s18 = scalar_lea.vmem %s1241_s2, %s816_s28 }
  0x49   : > { %v360_v4 = vld [vmem:[%s326_s18] sm:$0xff] }
  0x4a   : > { %v362_v5 = vld [vmem:[%s326_s18 + $0x40] sm:$0xff]  ;;  %361 = vst [vmem:[%s319_s19] sm:$0xff] %v360_v4 }
  0x4b   : > { %v364_v6 = vld [vmem:[%s326_s18 + $0x80] sm:$0xff]  ;;  %363 = vst [vmem:[%s319_s19 + $0x8] sm:$0xff] %v362_v5 }
  0x4c   : > { %365 = vst [vmem:[%s319_s19 + $0x10] sm:$0xff] %v364_v6  ;;  %v366_v7 = vld [vmem:[%s326_s18 + $0xc0] sm:$0xff] }
  0x4d   : > { %367 = vst [vmem:[%s319_s19 + $0x18] sm:$0xff] %v366_v7 }
  0x4e PF: > { %p817_p7 = scmp.ge.s32.totalorder %s1016_s13, 1  ;;  %p398_p8 = scmp.lt.s32.totalorder %s1016_s13, 17 }
  0x50   : > { %p399_p9 = pnand %p817_p7, %p398_p8 }
  0x51   : > { %v544_v8 = vld [vmem:[%s1244_s5] sm:$0xff] (!%p399_p9)  ;;  %vm546_vm0 = vcmask (!%p399_p9), 261120   ;;  %v1019_v9 = vmov (!%p399_p9), 0   ;;  %s405_s3 = sand.u32 (!%p399_p9), 1, %s1000_s9   ;;  %s412_s4 = sand.u32 (!%p399_p9), 1, %s992_s8   ;;  %v631_v11 = vld [vmem:[%s1245_s6 + $0x8] sm:$0xff] (!%p399_p9)  ;;  %v650_v2 = vlaneseq (!%p399_p9) }
  0x52   : > { %402 = sbr.rel (%p399_p9) target bundleno = 360 (0x168), region = 112  ;;  %844 = vmatprep.mubr.msk.f32.mxu0 (!%p399_p9), %vm546_vm0, %v544_v8  ;;  %929 = vset.pattern.permute.xlu0 (!%p399_p9), %v1019_v9  ;;  %v630_v10 = vld [vmem:[%s1245_s6] sm:$0xff] (!%p399_p9)  ;;  %s485_s21 = scvt.s32.f32 (!%p399_p9), %s1008_s11  ;;  %v545_v57 = vld [vmem:[%s1244_s5 + $0x8] sm:$0xff] (!%p399_p9) }
  0x53   : > { %634 = vperm.xlu0 (!%p399_p9), %929, %v630_v10   ;;  %s487_s26 = sld [smem:[#allocation3 + %s1008_s11]] (!%p399_p9)  ;;  %s819_s16 = sshll.u32 (!%p399_p9), %s412_s4, 5  ;;  %v651_v7 = vshrl.u32 (!%p399_p9), %v650_v2, 7 }
  0x54   : > { %s818_s17 = sshll.u32 (!%p399_p9), %s405_s3, 5  ;;  %s486_s18 = smul.f32 (!%p399_p9), 0.46666667, %s485_s21 }
  0x55   : > { %s414_s20 = scalar_lea.vmem (!%p399_p9), [#allocation5], %s819_s16  ;;  %s407_s23 = scalar_lea.vmem (!%p399_p9), [#allocation4], %s818_s17  ;;  %v652_v10 = vsub.s32 (!%p399_p9), 0, %v651_v7 }
  0x56   : > { %v494_v12 = vld [vmem:[%s414_s20] sm:$0xff] (!%p399_p9)  ;;  %v495_v13 = vld [vmem:[%s414_s20 + $0x8] sm:$0xff] (!%p399_p9)  ;;  %v496_v14 = vld [vmem:[%s414_s20 + $0x10] sm:$0xff] (!%p399_p9)  ;;  %s471_s3 = sld [smem:[#allocation3 + %s1008_s11]] (!%p399_p9) }
  0x57   : > { %639 = vperm.xlu0 (!%p399_p9), %929, %v631_v11   ;;  %v490_v15 = vld [vmem:[%s407_s23] sm:$0xff] (!%p399_p9)  ;;  %v497_v16 = vld [vmem:[%s414_s20 + $0x18] sm:$0xff] (!%p399_p9)  ;;  %v491_v17 = vld [vmem:[%s407_s23 + $0x8] sm:$0xff] (!%p399_p9)  ;;  %s464_s4 = sld [smem:[#allocation3 + %s1008_s11]] (!%p399_p9)  ;;  %s454_s20 = sand.u32 (!%p399_p9), 1, %s984_s29  }
  0x58   : > { %v492_v18 = vld [vmem:[%s407_s23 + $0x10] sm:$0xff] (!%p399_p9)  ;;  %v493_v19 = vld [vmem:[%s407_s23 + $0x18] sm:$0xff] (!%p399_p9)  ;;  %s1256_s28 = sld [smem:[#allocation9_spill]] (!%p399_p9)  ;;  %s820_s23 = sshll.u32 (!%p399_p9), %s454_s20, 4 }
  0x59   : > { %s488_s19 = scvt.s32.f32 %s487_s26  ;;  %s827_s9 = sshll.u32 (%p1142_p3), %s1008_s11, 3 }
  0x5b   : > { %s489_s25 = ssub.f32 %s486_s18, %s488_s19  ;;  %s1257_s19 = sld [smem:[#allocation10_spill]] }
  0x5c   : > { %s472_s21 = sadd.s32 1, %s471_s3  ;;  %s1258_s3 = sld [smem:[#allocation11_spill]] (%p1142_p3) }
  0x5d   : > { %s498_s8 = ssub.f32 1.0, %s489_s25  ;;  %v1186_v20 = vstv %s489_s25  ;;  %p473_p10 = scmp.lt.s32.totalorder %s472_s21, 7 }
  0x5e   : > { %v505_v21 = vmul.f32 %v1186_v20, %v494_v12  ;;  %v506_v22 = vmul.f32 %v1186_v20, %v495_v13  ;;  %v507_v23 = vmul.f32 %v1186_v20, %v496_v14  ;;  %v508_v25 = vmul.f32 %v1186_v20, %v497_v16  ;;  %p466_p11 = scmp.lt.s32.totalorder %s464_s4, 7 }
  0x5f   : > { %v499_v24 = vstv %s498_s8  ;;  %s1277_s21 = smov (!%p473_p10, %s472_s21), 7  ;;  %s456_s8 = scalar_lea.vmem [#allocation6], %s820_s23 }
  0x60   : > { %v500_v26 = vmul.f32 %v499_v24, %v490_v15  ;;  %v501_v27 = vmul.f32 %v499_v24, %v491_v17  ;;  %v502_v28 = vmul.f32 %v499_v24, %v492_v18  ;;  %v503_v29 = vmul.f32 %v499_v24, %v493_v19  ;;  %s1279_s4 = smov (!%p466_p11, %s464_s4), 7  ;;  %s1281_s21 = smov (!%p473_p10, %s1277_s21), 7 }
  0x61   : > { %s468_s16 = scalar_lea.vmem %s1256_s28, %s1279_s4  ;;  %s478_s25 = scalar_lea.vmem %s1257_s19, %s1281_s21 }
  0x62   : > { %v509_v30 = vadd.f32 %v505_v21, %v500_v26  ;;  %v510_v31 = vadd.f32 %v506_v22, %v501_v27  ;;  %v511_v32 = vadd.f32 %v507_v23, %v502_v28  ;;  %v512_v33 = vadd.f32 %v508_v25, %v503_v29  ;;  %v644_v3 = vld [vmem:[%s468_s16] sm:$0x1]  ;;  %s668_s4 = scalar_lea.vmem (%p1142_p3), %s1258_s3, %s827_s9 }
  0x63   : > { %v645_v4 = vld [vmem:[%s478_s25] sm:$0x1]  ;;  %v646_v5 = vmul.f32 %v644_v3, %v499_v24 }
  0x64   : > { %v513_v34 = vadd.f32 %v510_v31, %v509_v30  ;;  %v647_v6 = vmul.f32 %v645_v4, %v1186_v20 }
  0x66   : > { %v514_v35 = vadd.f32 %v513_v34, %v511_v32  ;;  %v648_v9 = vadd.f32 %v647_v6, %v646_v5 }
  0x68   : > { %v515_v36 = vadd.f32 %v514_v35, %v512_v33  ;;  %v653_v14 = vrot.slane %v648_v9, %v652_v10 }
  0x6a   : > { %v516_v37 = vrot.slane %v515_v36, 4 }
  0x6c   : > { %v517_v38 = vadd.f32 %v516_v37, %v515_v36 }
  0x6e   : > { %v518_v39 = vrot.slane %v517_v38, 2 }
  0x70   : > { %v519_v40 = vadd.f32 %v518_v39, %v517_v38 }
  0x72   : > { %v520_v41 = vrot.slane %v519_v40, 1 }
  0x74   : > { %v521_v42 = vadd.f32 %v520_v41, %v519_v40 }
  0x76   : > { %v523_v43 = vmul.f32 0.03125, %v521_v42 }
  0x78   : > { %v524_v44 = vsub.f32 %v509_v30, %v523_v43  ;;  %v525_v45 = vsub.f32 %v510_v31, %v523_v43  ;;  %v526_v46 = vsub.f32 %v511_v32, %v523_v43  ;;  %v527_v47 = vsub.f32 %v512_v33, %v523_v43 }
  0x7a   : > { %v528_v48 = vmul.f32 %v524_v44, %v524_v44  ;;  %v529_v49 = vmul.f32 %v525_v45, %v525_v45  ;;  %v847_v50 = vpack.c.bf16 %v525_v45, %v524_v44  ;;  %v530_v51 = vmul.f32 %v526_v46, %v526_v46 }
  0x7b   : > { %v851_v52 = vpack.c.bf16 %v527_v47, %v526_v46  ;;  %v531_v54 = vmul.f32 %v527_v47, %v527_v47 }
  0x7c   : > { %v532_v53 = vadd.f32 %v529_v49, %v528_v48  ;;  %848 = vmatprep.subr.bf16.mxu0 %v847_v50 }
  0x7d   : > { %850 = vmatpush3.bf16.msra.mxu0 %v847_v50 }
  0x7e   : > { %v533_v55 = vadd.f32 %v532_v53, %v530_v51  ;;  %852 = vmatprep.subr.bf16.mxu0 %v851_v52 }
  0x80   : > { %v534_v56 = vadd.f32 %v533_v55, %v531_v54 }
  0x81   : > { %854 = vmatpush3.bf16.msra.mxu0 %v851_v52 }
  0x82   : > { %v535_v58 = vrot.slane %v534_v56, 4 }
  0x84   : > { %845 = vmatmul.mubr.msk.f32.vlgmr.msra.gmra.mrb[0].mxu0 %vm546_vm0, %v545_v57  ;;  %v536_v59 = vadd.f32 %v535_v58, %v534_v56 }
  0x86   : > { %v537_v60 = vrot.slane %v536_v59, 2 }
  0x88   : > { %v538_v61 = vadd.f32 %v537_v60, %v536_v59 }
  0x8a   : > { %v539_v62 = vrot.slane %v538_v61, 1 }
  0x8c   : > { %v540_v63 = vadd.f32 %v539_v62, %v538_v61 }
  0x8e   : > { %v541_v0 = vmul.f32 0.03125, %v540_v63 }
  0x90   : > { %v542_v1 = vadd.f32 1e-05, %v541_v0 }
  0x92   : > { %930 = vrsqrt.f32 %v542_v1 }
  0x9c   : > { %v931_v11 = vpop.eup %930 }
  0xd2   : > { %v635_v8 = vpop.permute.xlu0 %634 }
  0xd6   : > { %v640_v16 = vpop.permute.xlu0 %639 }
 0x157   : > { %v846_v12 = vpop.f32.mrb[0].mxu0 }
 0x158   : > { %v629_v13 = vmul.f32 %v931_v11, %v846_v12  ;;  %v619_v15 = vpop.f32.mrb[1].mxu0 }
 0x159   : > { %v628_v17 = vmul.f32 %v931_v11, %v619_v15  ;;  %665 = sbr.rel (!%p1142_p3) target bundleno = 360 (0x168), region = 124 }
 0x15a   : > { %v643_v18 = vadd.f32 %v640_v16, %v629_v13 }
 0x15b   : > { %v642_v19 = vadd.f32 %v635_v8, %v628_v17 }
 0x15c   : > { %v656_v21 = vmul.f32 %v653_v14, %v643_v18 }
 0x15d   : > { %v655_v22 = vmul.f32 %v653_v14, %v642_v19 }
 0x15e   : > { %658 = vst [vmem:[%s456_s8 + $0x8] sm:$0xff] %v656_v21 }
 0x15f   : > { %657 = vst [vmem:[%s456_s8] sm:$0xff] %v655_v22 }
 0x165   : > { %v700_v23 = vld [vmem:[%s456_s8 + $0x8] sm:$0xff] }
 0x166   : > { %v698_v20 = vld [vmem:[%s456_s8] sm:$0xff]  ;;  %701 = vst [vmem:[%s668_s4 + $0x80] sm:$0xff] %v700_v23 }
 0x167   : > { %699 = vst [vmem:[%s668_s4] sm:$0xff] %v698_v20 }
 0x168 PF: > { %s23_s13 = sadd.s32 1, %s1016_s13   ;;  %s1259_s14 = sld [smem:[#allocation8_spill]] }
 0x169   : > { %p20_p12 = scmp.ge.s32.totalorder %s23_s13, 18   ;;  %s1260_s29 = smov %s988_s30 }
 0x16a   : > { %s1261_s30 = smov %s1149_s7  ;;  %s1262_s8 = smov %s996_s0 }
 0x16b   : > { %s1263_s0 = smov %s1153_s15  ;;  %s1264_s9 = smov %s1004_s10 }
 0x16c   : > { %s1265_s10 = smov %s1140_s22  ;;  %s1266_s11 = smov %s1012_s12 }
 0x16d   :  { %22 = sbr.rel (!%p20_p12) target bundleno = 21 (0x15), region = 207 }
 0x16e   : > { %s1267_s12 = smov %s1259_s14 }

</bundles_post_ra>
